<compile_context>
chip_gen: v6e
topology: v6e:2x2x1
jax: 0.10.0
libtpu: 0.0.40
codegen_flags: <defaults>
</compile_context>

<pallas_src>
import functools

import jax
import jax.numpy as jnp
from jax.experimental import pallas as pl
from jax.experimental.pallas import tpu as pltpu

LANES = 128
MAX_BLOCK_ROWS = 4096      # (4096, 128) f32 = 2 MiB per input per buffer
NCORES = 2                 # leading "parallel" grid axis (megacore; sequential loop on 1-TC chips)
PAD_LOGIT = -1.0e4         # padded element (with t=0): loss == 0, so no mask stream needed


def _int_pow(v, p):
    """v**p for a small static Python int p >= 1 using only VPU multiplies."""
    result = None
    while True:
        if p & 1:
            result = v if result is None else result * v
        p >>= 1
        if p == 0:
            return result
        v = v * v


def _focal_sum_kernel(x_ref, t_ref, acc_ref, *, scale_k, int_k, pos_weight,
                      binary_targets, inner, block_rows, rows_valid, need_mask):
    i = pl.program_id(1)

    @pl.when(i == 0)
    def _():
        acc_ref[...] = jnp.zeros_like(acc_ref)

    x = x_ref[...].astype(jnp.float32)
    t = t_ref[...].astype(jnp.float32)

    # Stable BCE-with-logits, identical value to the reference two-exp form.
    e_x = jnp.exp(-jnp.abs(x))                                   # EUP
    bce = jnp.maximum(x, 0.0) - x * t + jnp.log1p(e_x)           # EUP log1p

    # Focal multiplier: exp(k * logsigmoid(z)) where x > 0, else 1;  z = -x*(2t-1).
    z = x * (1.0 - 2.0 * t)
    if binary_targets:
        e_z = e_x                      # t in {0,1} => |z| == |x|: reuse exp(-|x|)
    else:
        e_z = jnp.exp(-jnp.abs(z))                               # EUP
    if int_k is not None:
        if int_k == 0:
            mult = None                # exp(0) == 1 everywhere
        else:
            # sigmoid(z)**k : exp(logsigmoid(z)) == where(z>=0, 1, e_z) / (1 + e_z)
            sig = jnp.where(z >= 0.0, 1.0, e_z) / (1.0 + e_z)    # one divide (EUP recip)
            mult = jnp.where(x > 0.0, _int_pow(sig, int_k), 1.0)
    else:
        # General (non-integer k) fallback: keep the log-domain form.
        lsig = jnp.minimum(z, 0.0) - jnp.log1p(e_z)              # EUP log1p
        mult = jnp.where(x > 0.0, jnp.exp(scale_k * lsig), 1.0)  # EUP exp

    loss = bce if mult is None else mult * bce

    # Default weighting path of the module (pos_weight replaces the t+2 default).
    if pos_weight is not None:
        weight = t * (float(pos_weight) - 1.0) + 1.0
    else:
        weight = t + 2.0
    loss = loss * weight

    if need_mask:
        # Partial / duplicated (clamped) blocks: zero out rows past the valid range.
        c = pl.program_id(0)
        row0 = (c * inner + i) * block_rows
        rows = jax.lax.broadcasted_iota(jnp.int32, loss.shape, 0) + row0
        loss = jnp.where(rows < rows_valid, loss, 0.0)           # select, NaN-safe

    # Vreg-shaped accumulation: cheap VPU adds into the resident (8,128) output block;
    # the single cross-lane reduce + divide by N happens once in the wrapper.
    acc_ref[...] += loss.reshape(-1, 8, LANES).sum(axis=0)


def binary_reduced_focal_loss(logits, targets, *, gamma=2.0, threshold=0.5,
                              pos_weight=None, binary_targets=False):
    """Pallas TPU implementation of BinaryReducedFocalLoss.forward (reduction=True).

    Pass `targets` in bf16 (binary labels are exact in bf16) to halve that HBM stream;
    set `binary_targets=True` only when targets are exactly {0,1} (saves one EUP exp).
    """
    x = jnp.asarray(logits).reshape(-1)
    t = jnp.asarray(targets).reshape(-1)
    assert x.shape == t.shape, f"{t.shape} vs {x.shape}"
    n = x.shape[0]

    # Lane-dense (rows, 128) layout. Only the final <128-element sliver (if any) is
    # padded; padded elements contribute exactly 0 (PAD_LOGIT with t=0).
    rem = n % LANES
    if rem:
        pad = LANES - rem
        x = jnp.pad(x, (0, pad), constant_values=PAD_LOGIT)
        t = jnp.pad(t, (0, pad), constant_values=0)
    rows_valid = (n + LANES - 1) // LANES
    x2 = x.reshape(rows_valid, LANES)
    t2 = t.reshape(rows_valid, LANES)
    if rows_valid < 8:  # tiny inputs: make the sublane dim a legal (8,128) tile
        pad_rows = 8 - rows_valid
        x2 = jnp.pad(x2, ((0, pad_rows), (0, 0)), constant_values=PAD_LOGIT)
        t2 = jnp.pad(t2, ((0, pad_rows), (0, 0)), constant_values=0)
        rows_valid = 8

    # Tiling: big blocks (multiple of 8 rows), partial last block handled in-kernel.
    block_rows = min(MAX_BLOCK_ROWS, ((pl.cdiv(rows_valid, NCORES) + 7) // 8) * 8)
    total_blocks = pl.cdiv(rows_valid, block_rows)
    ncores = min(NCORES, total_blocks)
    inner = pl.cdiv(total_blocks, ncores)
    last_block = total_blocks - 1
    need_mask = (ncores * inner * block_rows != rows_valid)

    # Fold gamma/threshold into one constant; integer k -> VPU power path.
    k = float(gamma) / float(threshold)
    int_k = int(round(k)) if (abs(k - round(k)) < 1e-9 and 0 <= round(k) <= 16) else None

    kernel = functools.partial(
        _focal_sum_kernel, scale_k=k, int_k=int_k, pos_weight=pos_weight,
        binary_targets=bool(binary_targets), inner=inner, block_rows=block_rows,
        rows_valid=rows_valid, need_mask=need_mask)

    # Clamp overshoot grid steps onto the last real block (their rows get masked to 0),
    # so no DMA ever addresses a fully out-of-bounds block.
    in_spec = pl.BlockSpec(
        (block_rows, LANES),
        lambda c, i, _in=inner, _lb=last_block: (jnp.minimum(c * _in + i, _lb), 0))
    # Each core accumulates into its own resident (8, 128) output block.
    out_spec = pl.BlockSpec((8, LANES), lambda c, i: (c, 0))

    n_trans = 3 if (binary_targets and int_k is not None) else (4 if int_k is not None else 5)
    cost = pl.CostEstimate(
        flops=25 * int(x2.size),
        transcendentals=n_trans * int(x2.size),
        bytes_accessed=int(x2.size * x2.dtype.itemsize
                           + t2.size * t2.dtype.itemsize
                           + ncores * 8 * LANES * 4))

    partials = pl.pallas_call(
        kernel,
        out_shape=jax.ShapeDtypeStruct((ncores * 8, LANES), jnp.float32),
        grid_spec=pltpu.PrefetchScalarGridSpec(
            num_scalar_prefetch=0,
            grid=(ncores, inner),
            in_specs=[in_spec, in_spec],
            out_specs=out_spec,
        ),
        compiler_params=pltpu.CompilerParams(
            dimension_semantics=("parallel", "arbitrary"),
            vmem_limit_bytes=32 * 1024 * 1024),
        cost_estimate=cost,
    )(x2, t2)

    return (jnp.sum(partials) / jnp.float32(n)).astype(jnp.float32)


def _reference(logits, targets, gamma=2.0, threshold=0.5):
    # Pure-JAX reference mirroring the PyTorch code line by line.
    x = jnp.asarray(logits, jnp.float32).reshape(-1, 1)
    t = jnp.asarray(targets, jnp.float32).reshape(-1, 1)
    weight = t + 2.0
    max_val = jnp.maximum(-x, 0.0)
    loss = x - x * t + max_val + jnp.log(jnp.exp(-max_val) + jnp.exp(-x - max_val))
    invprobs = jax.nn.log_sigmoid(-x * (t * 2.0 - 1.0))
    invprobs = jnp.where(x > 0.0, invprobs, 0.0)
    loss = jnp.exp(invprobs / threshold * gamma) * loss
    loss = loss * weight
    return jnp.mean(loss)


if __name__ == "__main__":
    key = jax.random.PRNGKey(0)
    kx, kt, kx2, kt2 = jax.random.split(key, 4)

    # NCHW logits, binary targets — N=2, C=4, H=W=16 -> 2048 elements.
    # Targets supplied in bf16 (exact for {0,1} labels; halves the target HBM stream).
    x = jax.random.normal(kx, (2, 4, 16, 16), dtype=jnp.float32) * 2.0
    t = (jax.random.uniform(kt, (2, 4, 16, 16)) > 0.5).astype(jnp.bfloat16)

    out = jax.block_until_ready(binary_reduced_focal_loss(x, t, binary_targets=True))
    ref = _reference(x, t)
    assert jnp.allclose(out, ref, rtol=1e-5, atol=1e-5), (out, ref)

    # Awkward size (3*5*7*11 = 1155, not a multiple of 128) with soft targets:
    # exercises the lane-sliver pad, the partial-block mask, the index-map clamp and
    # the general (non-binary) transcendental path.
    x_odd = jax.random.normal(kx2, (3, 5, 7, 11), dtype=jnp.float32) * 2.0
    t_odd = jax.random.uniform(kt2, (3, 5, 7, 11), dtype=jnp.float32)
    out_odd = jax.block_until_ready(
        binary_reduced_focal_loss(x_odd, t_odd, binary_targets=False))
    ref_odd = _reference(x_odd, t_odd)
    assert jnp.allclose(out_odd, ref_odd, rtol=1e-5, atol=1e-5), (out_odd, ref_odd)

    print("KERNEL_OK")
</pallas_src>

<mosaic_0001>
module attributes {stable_mosaic.version = 11 : i64} {
  func.func @_focal_sum_kernel(%arg0: i32, %arg1: i32, %arg2: memref<8x128xf32, #tpu.memory_space<vmem>>, %arg3: memref<8x128xbf16, #tpu.memory_space<vmem>>, %arg4: memref<8x128xf32, #tpu.memory_space<vmem>>) attributes {dimension_semantics = [#tpu.dimension_semantics<parallel>, #tpu.dimension_semantics<arbitrary>], iteration_bounds = array<i64: 2, 1>, scalar_prefetch = 0 : i64, scratch_operands = 0 : i64, tpu.core_type = #tpu.core_type<tc>, window_params = [{transform_indices = @transform_0, window_bounds = array<i64: 8, 128>}, {transform_indices = @transform_1, window_bounds = array<i64: 8, 128>}, {transform_indices = @transform_2, window_bounds = array<i64: 8, 128>}]} {
    %c0_i32 = arith.constant 0 : i32
    %0 = arith.cmpi eq, %arg1, %c0_i32 : i32
    %1 = arith.extui %0 : i1 to i32
    %c0_i32_0 = arith.constant 0 : i32
    %2 = arith.cmpi ne, %1, %c0_i32_0 : i32
    scf.if %2 {
      %cst_18 = arith.constant 0.000000e+00 : f32
      %43 = vector.broadcast %cst_18 : f32 to vector<8x128xf32>
      %c0_19 = arith.constant 0 : index
      %c0_20 = arith.constant 0 : index
      %44 = vector.load %arg4[%c0_19, %c0_20] : memref<8x128xf32, #tpu.memory_space<vmem>>, vector<8x128xf32>
      tpu.vector_store %arg4[%c0_19, %c0_20], %43 {strides = array<i32>} : memref<8x128xf32, #tpu.memory_space<vmem>>, vector<8x128xf32>,
    } else {
    }
    %c0 = arith.constant 0 : index
    %c0_1 = arith.constant 0 : index
    %3 = vector.load %arg2[%c0, %c0_1] : memref<8x128xf32, #tpu.memory_space<vmem>>, vector<8x128xf32>
    %c0_2 = arith.constant 0 : index
    %c0_3 = arith.constant 0 : index
    %4 = vector.load %arg3[%c0_2, %c0_3] : memref<8x128xbf16, #tpu.memory_space<vmem>>, vector<8x128xbf16>
    %5 = arith.extf %4 : vector<8x128xbf16> to vector<8x128xf32>
    %6 = math.absf %3 : vector<8x128xf32>
    %cst = arith.constant 0.000000e+00 : f32
    %7 = vector.broadcast %cst : f32 to vector<8x128xf32>
    %8 = arith.subf %7, %6 : vector<8x128xf32>
    %9 = math.exp %8 : vector<8x128xf32>
    %cst_4 = arith.constant 0.000000e+00 : f32
    %10 = vector.broadcast %cst_4 : f32 to vector<8x128xf32>
    %11 = arith.maximumf %3, %10 : vector<8x128xf32>
    %12 = arith.mulf %3, %5 : vector<8x128xf32>
    %13 = arith.subf %11, %12 : vector<8x128xf32>
    %14 = math.log1p %9 : vector<8x128xf32>
    %15 = arith.addf %13, %14 : vector<8x128xf32>
    %cst_5 = arith.constant 2.000000e+00 : f32
    %16 = vector.broadcast %cst_5 : f32 to vector<8x128xf32>
    %17 = arith.mulf %16, %5 : vector<8x128xf32>
    %cst_6 = arith.constant 1.000000e+00 : f32
    %18 = vector.broadcast %cst_6 : f32 to vector<8x128xf32>
    %19 = arith.subf %18, %17 : vector<8x128xf32>
    %20 = arith.mulf %3, %19 : vector<8x128xf32>
    %cst_7 = arith.constant 0.000000e+00 : f32
    %21 = vector.broadcast %cst_7 : f32 to vector<8x128xf32>
    %22 = arith.cmpf oge, %20, %21 : vector<8x128xf32>
    %cst_8 = arith.constant 1.000000e+00 : f32
    %23 = vector.broadcast %cst_8 : f32 to vector<8x128xf32>
    %24 = arith.select %22, %23, %9 : vector<8x128xi1>, vector<8x128xf32>
    %cst_9 = arith.constant 1.000000e+00 : f32
    %25 = vector.broadcast %cst_9 : f32 to vector<8x128xf32>
    %26 = arith.addf %25, %9 : vector<8x128xf32>
    %27 = arith.divf %24, %26 : vector<8x128xf32>
    %cst_10 = arith.constant 0.000000e+00 : f32
    %28 = vector.broadcast %cst_10 : f32 to vector<8x128xf32>
    %29 = arith.cmpf ogt, %3, %28 : vector<8x128xf32>
    %30 = arith.mulf %27, %27 : vector<8x128xf32>
    %31 = arith.mulf %30, %30 : vector<8x128xf32>
    %cst_11 = arith.constant 1.000000e+00 : f32
    %32 = vector.broadcast %cst_11 : f32 to vector<8x128xf32>
    %33 = arith.select %29, %31, %32 : vector<8x128xi1>, vector<8x128xf32>
    %34 = arith.mulf %33, %15 : vector<8x128xf32>
    %cst_12 = arith.constant 2.000000e+00 : f32
    %35 = vector.broadcast %cst_12 : f32 to vector<8x128xf32>
    %36 = arith.addf %5, %35 : vector<8x128xf32>
    %37 = arith.mulf %34, %36 : vector<8x128xf32>
    %c0_13 = arith.constant 0 : index
    %c0_14 = arith.constant 0 : index
    %38 = vector.load %arg4[%c0_13, %c0_14] : memref<8x128xf32, #tpu.memory_space<vmem>>, vector<8x128xf32>
    %39 = vector.shape_cast %37 : vector<8x128xf32> to vector<1x8x128xf32>
    %cst_15 = arith.constant dense<0.000000e+00> : vector<8x128xf32>
    %40 = vector.multi_reduction <add>, %39, %cst_15 [0] : vector<1x8x128xf32> to vector<8x128xf32>
    %41 = arith.addf %38, %40 : vector<8x128xf32>
    %c0_16 = arith.constant 0 : index
    %c0_17 = arith.constant 0 : index
    %42 = vector.load %arg4[%c0_16, %c0_17] : memref<8x128xf32, #tpu.memory_space<vmem>>, vector<8x128xf32>
    tpu.vector_store %arg4[%c0_16, %c0_17], %41 {strides = array<i32>} : memref<8x128xf32, #tpu.memory_space<vmem>>, vector<8x128xf32>,
    return
  }
  func.func @transform_0(%arg0: i32, %arg1: i32) -> (i32, i32) {
    %c1_i32 = arith.constant 1 : i32
    %0 = arith.muli %arg0, %c1_i32 : i32
    %1 = arith.addi %0, %arg1 : i32
    %c1_i32_0 = arith.constant 1 : i32
    %2 = arith.minsi %1, %c1_i32_0 : i32
    %c0_i32 = arith.constant 0 : i32
    %c0_i32_1 = arith.constant 0 : i32
    return %2, %c0_i32 : i32, i32
  }
  func.func @transform_1(%arg0: i32, %arg1: i32) -> (i32, i32) {
    %c1_i32 = arith.constant 1 : i32
    %0 = arith.muli %arg0, %c1_i32 : i32
    %1 = arith.addi %0, %arg1 : i32
    %c1_i32_0 = arith.constant 1 : i32
    %2 = arith.minsi %1, %c1_i32_0 : i32
    %c0_i32 = arith.constant 0 : i32
    %c0_i32_1 = arith.constant 0 : i32
    return %2, %c0_i32 : i32, i32
  }
  func.func @transform_2(%arg0: i32, %arg1: i32) -> (i32, i32) {
    %c0_i32 = arith.constant 0 : i32
    %c0_i32_0 = arith.constant 0 : i32
    return %arg0, %c0_i32 : i32, i32
  }
}

</mosaic_0001>

<bundles_post_ra>
// kernel: tpu_custom_call.1
= control target key start
LH: loop header
LB: loop body
LE: loop exit
PB: predicated region body
PF: predicated region fallthrough
CT: control target
= control target key end

     0   :  { %s883_s0 = inlined_call_operand.hbm [shape: f32[16,128], index: 0, kind: input, shape index: {}]   ;;  %s884_s1 = inlined_call_operand.hbm [shape: bf16[16,128], index: 1, kind: input, shape index: {}]   ;;  %s885_s2 = inlined_call_operand.hbm [shape: f32[16,128], index: 2, kind: output, shape index: {}]  }
   0x1   :  { %887 = sst [smem:[#allocation12_spill]] %s883_s0 }
   0x2   :  { %7 = vsyncpa [#allocation3], 0 }
   0x3   :  { %9 = vsyncpa [#allocation3 + $0x1], 0 }
   0x4   :  { %10 = vsyncpa [#allocation6], 0 }
   0x5   :  { %12 = vsyncpa [#allocation6 + $0x1], 0 }
   0x6   :  { %13 = vsyncpa [#allocation4], 0 }
   0x7   :  { %15 = vsyncpa [#allocation4 + $0x1], 0  ;;  %s689_s9 = smov 0   ;;  %s691_s10 = smov 0  }
   0x8   :  { %s693_s11 = smov 0   ;;  %s695_s12 = smov 0  }
   0x9   :  { %s697_s13 = smov 0   ;;  %s699_s14 = smov 0  }
   0xa   :  { %s701_s15 = smov 0   ;;  %s703_s16 = smov 0  }
   0xb   :  { %s705_s17 = smov 0  }
   0xc LB: > { %s391_s18 = sadd.s32 4294967295, %s669_s17   ;;  %s392_s19 = sadd.s32 4294967294, %s669_s17   ;;  %s669_s17 = sphi %s705_s17, %s21_s17   ;;  %s665_s16 = sphi %s703_s16, %s905_s16   ;;  %s661_s15 = sphi %s701_s15, %s904_s15   ;;  %s657_s14 = sphi %s699_s14, %s903_s14   ;;  %s653_s13 = sphi %s697_s13, %s902_s13   ;;  %s649_s12 = sphi %s695_s12, %s901_s12   ;;  %s645_s11 = sphi %s693_s11, %s900_s11   ;;  %s641_s10 = sphi %s691_s10, %s899_s10   ;;  %s637_s9 = sphi %s689_s9, %s898_s9  }
   0xd   : > { %s33_s20 = sadd.s32 1, %s665_s16  ;;  %p38_p0 = scmp.lt.s32.totalorder %s665_s16, 1 }
   0xe   : > { %p35_p1 = scmp.ge.s32.totalorder %s33_s20, 2  ;;  %s46_s21 = sadd.s32 1, %s657_s14 }
   0xf   : > { %s738_s22 = scalar_select %p38_p0, %s665_s16, 1 }
  0x10   : > { %s907_s20 = smov (%p35_p1, %s33_s20), 0  ;;  %p53_p2 = scmp.ne.s32.totalorder %s657_s14, %s653_s13 }
  0x11   : > { %888 = sst [smem:[#allocation11_spill]] %s907_s20  ;;  %p54_p3 = scmp.eq.s32.totalorder %s669_s17, 0 }
  0x12   : > { %p41_p4 = scmp.lt.s32.totalorder %s907_s20, 1  ;;  %p59_p5 = scmp.ne.s32.totalorder %s653_s13, %s649_s12 }
  0x13   : > { %p747_p6 = por %p54_p3, %p53_p2  ;;  %p60_p7 = scmp.eq.s32.totalorder %s391_s18, 0 }
  0x14   : > { %s42_s24 = scalar_select %p41_p4, %s907_s20, 1 }
  0x15   : > { %p752_p8 = por %p60_p7, %p59_p5  ;;  %s101_s26 = ssub.s32 %s665_s16, %s907_s20 }
  0x16   : > { %s43_s27 = ssub.s32 %s738_s22, %s42_s24  ;;  %p102_p9 = scmp.eq.s32.totalorder %s101_s26, 0 }
  0x17   : > { %p44_p10 = scmp.eq.s32.totalorder %s43_s27, 0  ;;  %s104_s28 = sadd.s32 1, %s645_s11 }
  0x18   : > { %s761_s29 = scalar_select %p102_p9, %s645_s11, %s104_s28  }
  0x19   : > { %s764_s30 = scalar_select %p44_p10, %s657_s14, %s46_s21  }
  0x1a   : > { %p114_p11 = scmp.ne.s32.totalorder %s645_s11, %s641_s10  ;;  %p115_p12 = scmp.eq.s32.totalorder %s391_s18, 1 }
  0x1b   : > { %p120_p13 = scmp.ne.s32.totalorder %s641_s10, %s637_s9  ;;  %p121_p0 = scmp.eq.s32.totalorder %s392_s19, 1 }
  0x1c   : > { %p770_p1 = por %p115_p12, %p114_p11  ;;  %p424_p4 = scmp.lt.s32.totalorder %s669_s17, 2 }
  0x1d   : > { %p775_p3 = por %p121_p0, %p120_p13  ;;  %s781_s5 = sand.u32 1, %s657_s14  }
  0x1e   : > { %s396_s6 = sshll.u32 %s738_s22, 7  ;;  %s395_s7 = sshll.u32 %s781_s5, 3 }
  0x1f   : > { %s893_s0 = sld [smem:[#allocation12_spill]]  ;;  %s145_s19 = scalar_lea.vmem [#allocation2], %s395_s7 }
  0x20   : > { %s155_s21 = sshll.u32 %s145_s19, 4  ;;  %p790_p5 = pnand %p424_p4, %p747_p6  ;;  %s156_s21 = int_to_ptr.vmem [resolvable:$true] %s155_s21 }
  0x21   : > { %p399_p7 = scmp.ge.s32.totalorder %s669_s17, 1  ;;  %p181_p9 = scmp.lt.s32.totalorder %s669_s17, 3 }
  0x22   : > { %s142_s26 = scalar_lea.sflag [#allocation3], %s781_s5  ;;  %p507_p10 = pneg %p790_p5 }
  0x23   : > { %s518_s27 = scalar_lea.vmem %s156_s21, 128  ;;  %s671_s28 = smov [#allocation2]  }
  0x24   : > { %p519_p11 = scmp.ne.s32.totalorder %s156_s21, %s518_s27  ;;  %s523_s23 = sshll.u32 %s671_s28, 4  ;;  %s524_s23 = int_to_ptr.vmem [resolvable:$false] %s523_s23 }
  0x25   : > { %s153_s18 = scalar_lea.hbm %s893_s0, %s396_s6  ;;  %s525_s6 = scalar_lea.vmem %s524_s23, 256 }
  0x26   : > { %p521_p12 = pnand %p519_p11, %p507_p10  ;;  %p526_p6 = scmp.lt.s32.totalorder %s156_s21, %s524_s23 }
  0x27   : > { %p527_p0 = scmp.lt.s32.totalorder %s525_s6, %s518_s27 }
  0x28   : > { %p522_p13 = pneg %p521_p12 }
  0x29   : > { %p528_p4 = por %p527_p0, %p526_p6 }
  0x2b   : > { %p529_p2 = pnand %p528_p4, %p522_p13 }
  0x2d   : > { %532 = shalt.err (!%p529_p2)
}
  0x2e   : > { %416 = dma.hbm_to_vmem [thread:$0]  (!%p790_p5), %s153_s18, 128, %s156_s21, %s142_s26  }
  0x2f   : > { %p808_p11 = pnand %p399_p7, %p181_p9  ;;  %s397_s8 = sshll.u32 %s781_s5, 2 }
  0x30   : > { %s398_s12 = sshll.u32 %s738_s22, 6  ;;  %s166_s23 = scalar_lea.vmem [#allocation5], %s397_s8 }
  0x31   : > { %s174_s28 = scalar_lea.hbm %s884_s1, %s398_s12  ;;  %s176_s6 = sshll.u32 %s166_s23, 4  ;;  %s177_s6 = int_to_ptr.vmem [resolvable:$true] %s176_s6 }
  0x32   : > { %s163_s0 = scalar_lea.sflag [#allocation6], %s781_s5  ;;  %s546_s20 = scalar_lea.vmem %s177_s6, 64 }
  0x33   : > { %p547_p2 = scmp.ne.s32.totalorder %s177_s6, %s546_s20  ;;  %s672_s18 = smov [#allocation5]  }
  0x34   : > { %s551_s21 = sshll.u32 %s672_s18, 4  ;;  %s552_s21 = int_to_ptr.vmem [resolvable:$false] %s551_s21 }
  0x35   : > { %p549_p12 = pnand %p547_p2, %p507_p10  ;;  %s553_s26 = scalar_lea.vmem %s552_s21, 128 }
  0x36   : > { %p554_p7 = scmp.lt.s32.totalorder %s177_s6, %s552_s21  ;;  %p555_p9 = scmp.lt.s32.totalorder %s553_s26, %s546_s20 }
  0x37   : > { %p550_p13 = pneg %p549_p12 }
  0x38   : > { %p556_p6 = por %p555_p9, %p554_p7 }
  0x3a   : > { %p557_p0 = pnand %p556_p6, %p550_p13 }
  0x3c   : > { %560 = shalt.err (!%p557_p0)
}
  0x3d   : > { %419 = dma.hbm_to_vmem [thread:$0]  (!%p790_p5), %s174_s28, 64, %s177_s6, %s163_s0  }
  0x3e   : > { %185 = sbr.rel (%p808_p11) target bundleno = 133 (0x85), region = 28  ;;  %s187_s22 = sand.u32 (!%p808_p11), 1, %s653_s13  }
  0x3f   : > { %s400_s5 = sshll.u32 (!%p808_p11), %s187_s22, 3  ;;  %s188_s8 = scalar_lea.sflag (!%p808_p11), [#allocation3], %s187_s22 }
  0x40   : > { %s191_s12 = scalar_lea.vmem (!%p808_p11), [#allocation2], %s400_s5 }
  0x43   : > { %624 = dma.done.wait (%p752_p8), %s188_s8, 128  }
  0x44   : > { %626 = vsyncadd (%p752_p8), %s188_s8, 4294967168  ;;  %s401_s20 = sshll.u32 %s187_s22, 2  ;;  %s197_s19 = scalar_lea.sflag [#allocation6], %s187_s22 }
  0x45   : > { %s200_s27 = scalar_lea.vmem [#allocation5], %s401_s20 }
  0x46   : > { %628 = dma.done.wait (%p752_p8), %s197_s19, 64  }
  0x47   : > { %630 = vsyncadd (%p752_p8), %s197_s19, 4294967232  ;;  %v237_v0 = vld [vmem:[%s191_s12] sm:$0xff]  ;;  %v238_v4 = vld [vmem:[%s200_s27] sm:$0xf]  ;;  %s223_s0 = sand.u32 1, %s641_s10   ;;  %s404_s24 = sshll.u32 %s661_s15, 7 }
  0x48   : > { %v240_v1 = vand.u32 2147483647, %v237_v0  ;;  %v239_v5 = vunpack.c.l.bf16 %v238_v4  ;;  %v244_v14 = vmax.f32 %v237_v0, 0.0  ;;  %s402_s25 = sshll.u32 %s223_s0, 3  ;;  %vm265_vm2 = vcmp.gt.f32.partialorder %v237_v0, 0.0  ;;  %s288_s18 = scalar_lea.hbm %s885_s2, %s404_s24 }
  0x49   : > { %s225_s7 = scalar_lea.vmem [#allocation7], %s402_s25  ;;  %s277_s21 = scalar_lea.sflag [#allocation4], %s223_s0 }
  0x4a   : > { %v241_v2 = vsub.f32 0.0, %v240_v1  ;;  %v257_v7 = vmul.f32 2.0, %v239_v5  ;;  %v245_v15 = vmul.f32 %v239_v5, %v237_v0  ;;  %v270_v27 = vadd.f32 2.0, %v239_v5  ;;  %s290_s28 = sshll.u32 %s225_s7, 4  ;;  %s673_s22 = smov [#allocation7]   ;;  %s291_s28 = int_to_ptr.vmem [resolvable:$true] %s290_s28 }
  0x4b   : > { %s561_s26 = scalar_lea.vmem %s291_s28, 128  ;;  %s565_s5 = sshll.u32 %s673_s22, 4  ;;  %s566_s5 = int_to_ptr.vmem [resolvable:$false] %s565_s5 }
  0x4c   : > { %v242_v3 = vmul.f32 1.442695, %v241_v2  ;;  %v258_v9 = vsub.f32 1.0, %v257_v7  ;;  %v246_v20 = vsub.f32 %v244_v14, %v245_v15  ;;  %p562_p8 = scmp.ne.s32.totalorder %s291_s28, %s561_s26  ;;  %s567_s8 = scalar_lea.vmem %s566_s5, 256 }
  0x4d   : > { %p568_p4 = scmp.lt.s32.totalorder %s291_s28, %s566_s5  ;;  %p569_p11 = scmp.lt.s32.totalorder %s567_s8, %s561_s26 }
  0x4e   : > { %499 = vpow2.f32 %v242_v3  ;;  %v259_v11 = vmul.f32 %v258_v9, %v237_v0  ;;  %p563_p5 = pnand %p562_p8, %p770_p1 }
  0x4f   : > { %p570_p2 = por %p569_p11, %p568_p4 }
  0x50   : > { %vm260_vm0 = vcmp.ge.f32.partialorder %v259_v11, 0.0  ;;  %p564_p10 = pneg %p563_p5 }
  0x52   : > { %p571_p12 = pnand %p570_p2, %p564_p10 }
  0x5b   : > { %v500_v6 = vpop.eup %499 }
  0x5c   : > { %v247_v8 = vadd.f32 1.0, %v500_v6  ;;  %v250_v10 = vmul.f32 -0.5, %v500_v6  ;;  %v253_v13 = vand.u32 2147483647, %v500_v6  ;;  %v261_v17 = vsel %vm260_vm0, 1.0, %v500_v6 }
  0x5e   : > { %501 = vlog2.f32 %v247_v8  ;;  %v251_v12 = vadd.f32 1.0, %v250_v10  ;;  %vm254_vm1 = vcmp.lt.f32.partialorder %v253_v13, 0.0004427343 }
  0x5f   : > { %503 = vrcp.f32 %v247_v8 }
  0x60   : > { %v252_v16 = vmul.f32 %v500_v6, %v251_v12 }
  0x6b   : > { %v502_v18 = vpop.eup %501 }
  0x6c   : > { %v504_v19 = vpop.eup %503  ;;  %v249_v21 = vmul.f32 0.6931472, %v502_v18 }
  0x6d   : > { %v264_v22 = vmul.f32 %v504_v19, %v261_v17 }
  0x6e   : > { %v255_v23 = vsel %vm254_vm1, %v252_v16, %v249_v21 }
  0x6f   : > { %v266_v24 = vmul.f32 %v264_v22, %v264_v22  ;;  %v256_v25 = vadd.f32 %v255_v23, %v246_v20 }
  0x71   : > { %v267_v26 = vmul.f32 %v266_v24, %v266_v24 }
  0x73   : > { %v268_v28 = vsel %vm265_vm2, %v267_v26, 1.0 }
  0x74   : > { %v269_v29 = vmul.f32 %v268_v28, %v256_v25 }
  0x76   : > { %v271_v30 = vmul.f32 %v270_v27, %v269_v29 }
  0x78   : > { %275 = vst [vmem:[%s225_s7] sm:$0xff] %v271_v30 }
  0x79   : > { %574 = shalt.err (!%p571_p12)
}
  0x7a   : > { %s575_s15 = scalar_lea.hbm %s288_s18, 128  ;;  %s579_s19 = scalar_lea.hbm %s885_s2, 256 }
  0x7b   : > { %p576_p13 = scmp.ne.s32.totalorder %s288_s18, %s575_s15  ;;  %p580_p6 = scmp.lt.s32.totalorder %s288_s18, %s885_s2 }
  0x7c   : > { %p581_p0 = scmp.lt.s32.totalorder %s579_s19, %s575_s15 }
  0x7d   : > { %p577_p7 = pnand %p576_p13, %p770_p1 }
  0x7e   : > { %p582_p8 = por %p581_p0, %p580_p6 }
  0x7f   : > { %p578_p9 = pneg %p577_p7 }
  0x81   : > { %p583_p5 = pnand %p582_p8, %p578_p9 }
  0x83   : > { %586 = shalt.err (!%p583_p5)
}
  0x84   : > { %411 = dma.vmem_to_hbm [thread:$0]  (%p770_p1), %s291_s28, 128, %s288_s18, %s277_s21  }
  0x85 PF: > { %s302_s25 = sand.u32 1, %s637_s9   ;;  %p896_p10 = scmp.ge.s32.totalorder %s669_s17, 2 }
  0x86   : > { %s303_s24 = scalar_lea.sflag [#allocation4], %s302_s25 }
  0x87   : > { %p421_p4 = pnand %p896_p10, %p775_p3 }
  0x89   : > { %p422_p11 = pneg %p421_p4 }
  0x8b   : > { %632 = dma.done.wait (%p422_p11), %s303_s24, 128  }
  0x8c   : > { %634 = vsyncadd (%p422_p11), %s303_s24, 4294967168  ;;  %s21_s17 = sadd.s32 1, %s669_s17   ;;  %s897_s3 = sld [smem:[#allocation11_spill]] }
  0x8d   : > { %p18_p2 = scmp.ge.s32.totalorder %s21_s17, 4   ;;  %s898_s9 = smov %s641_s10 }
  0x8e   : > { %s899_s10 = smov %s645_s11  ;;  %s900_s11 = smov %s761_s29 }
  0x8f   : > { %s901_s12 = smov %s653_s13  ;;  %s902_s13 = smov %s657_s14 }
  0x90   : > { %s903_s14 = smov %s764_s30  ;;  %s904_s15 = smov %s665_s16 }
  0x91   :  { %20 = sbr.rel (!%p18_p2) target bundleno = 12 (0xc), region = 90 }
  0x92   : > { %s905_s16 = smov %s897_s3 }
  0x96   :  { %308 = vsyncpa [#allocation3], 1 }
  0x97   :  { %310 = vsyncpa [#allocation3 + $0x1], 1 }
  0x98   :  { %311 = vsyncpa [#allocation6], 1 }
  0x99   :  { %313 = vsyncpa [#allocation6 + $0x1], 1 }
  0x9a   :  { %314 = vsyncpa [#allocation4], 1 }
  0x9b   :  { %316 = vsyncpa [#allocation4 + $0x1], 1 }

</bundles_post_ra>
